<compile_context>
chip_gen: v7x
topology: tpu7x:2x2x1
jax: 0.10.0
libtpu: 0.0.40
codegen_flags: <defaults>
</compile_context>

<pallas_src>
import jax
import jax.numpy as jnp
from jax.experimental import pallas as pl
from jax.experimental.pallas import tpu as pltpu


def _round_up(x, m):
    return ((x + m - 1) // m) * m


def _softplus(x):
    # Numerically stable log(1 + exp(x)).
    return jnp.maximum(x, 0.0) + jnp.log1p(jnp.exp(-jnp.abs(x)))


def _splitter_loss_kernel(scal_ref, n_ref, node_ref, feat_ref, tgt_ref,
                          src_ref, orig_ref, out_ref, acc_main, acc_reg):
    i = pl.program_id(0)

    @pl.when(i == 0)
    def _init():
        acc_main[...] = jnp.zeros_like(acc_main)
        acc_reg[...] = jnp.zeros_like(acc_reg)

    # ---- main loss terms (feature-major slabs: (D, TN)) -------------------
    node = node_ref[...].astype(jnp.float32)
    feat = feat_ref[...].astype(jnp.float32)
    dot = jnp.sum(node * feat, axis=0, keepdims=True)      # (1, TN)
    nsq = jnp.sum(node * node, axis=0, keepdims=True)
    fsq = jnp.sum(feat * feat, axis=0, keepdims=True)
    # normalize(p=2, eps=1e-12) then dot  ==  dot / (max(|n|,eps)*max(|f|,eps))
    #   ==  dot * rsqrt(max(nsq,1e-24)) * rsqrt(max(fsq,1e-24))
    logit = (dot
             * jax.lax.rsqrt(jnp.maximum(nsq, 1e-24))
             * jax.lax.rsqrt(jnp.maximum(fsq, 1e-24)))

    t = tgt_ref[...].astype(jnp.float32)                    # (1, TN)
    # -[t*log(sigmoid(x)) + (1-t)*log(1-sigmoid(x))] == softplus(x) - t*x
    main_terms = _softplus(logit) - t * logit

    # ---- regularization terms ---------------------------------------------
    src = src_ref[...].astype(jnp.float32)
    orig = orig_ref[...].astype(jnp.float32)
    r = jnp.clip(jnp.sum(src * orig, axis=0, keepdims=True), -15.0, 15.0)
    # -log(sigmoid(r)) == softplus(-r)
    reg_terms = _softplus(-r)

    # ---- mask padded columns so the mean stays over the true N ------------
    tn = node.shape[1]
    col = jax.lax.broadcasted_iota(jnp.int32, (1, tn), 1) + i * tn
    mask = col < n_ref[0]

    acc_main[...] += jnp.sum(jnp.where(mask, main_terms, 0.0),
                             axis=1, keepdims=True)
    acc_reg[...] += jnp.sum(jnp.where(mask, reg_terms, 0.0),
                            axis=1, keepdims=True)

    @pl.when(i == pl.num_programs(0) - 1)
    def _finalize():
        lambd = scal_ref[0]
        inv_n = scal_ref[1]
        out_ref[...] = inv_n * (acc_main[...] + lambd * acc_reg[...])


def splitter_loss(node_f, feat_f, targets, src_f, orig_f, *, lambd,
                  tile_n=512):
    """Inputs are feature-major slabs (D, N); targets are (1, N)."""
    d, n = node_f.shape
    tn = min(_round_up(tile_n, 128), _round_up(n, 128))
    n_pad = _round_up(n, tn)
    pad = n_pad - n
    if pad:
        pad2 = ((0, 0), (0, pad))
        node_f = jnp.pad(node_f, pad2)
        feat_f = jnp.pad(feat_f, pad2)
        src_f = jnp.pad(src_f, pad2)
        orig_f = jnp.pad(orig_f, pad2)
        targets = jnp.pad(targets, pad2)

    scal = jnp.array([lambd, 1.0 / n], dtype=jnp.float32)
    n_arr = jnp.array([n], dtype=jnp.int32)

    slab_spec = pl.BlockSpec((d, tn), lambda i: (0, i))
    tgt_spec = pl.BlockSpec((1, tn), lambda i: (0, i))
    smem_spec = pl.BlockSpec(memory_space=pltpu.MemorySpace.SMEM)

    out = pl.pallas_call(
        _splitter_loss_kernel,
        out_shape=jax.ShapeDtypeStruct((1, 1), jnp.float32),
        grid=(n_pad // tn,),
        in_specs=[smem_spec, smem_spec,
                  slab_spec, slab_spec, tgt_spec, slab_spec, slab_spec],
        out_specs=pl.BlockSpec((1, 1), lambda i: (0, 0)),
        scratch_shapes=[pltpu.VMEM((1, 1), jnp.float32),
                        pltpu.VMEM((1, 1), jnp.float32)],
        compiler_params=pltpu.CompilerParams(
            dimension_semantics=("arbitrary",)),
    )(scal, n_arr, node_f, feat_f, targets, src_f, orig_f)
    return out[0, 0]


class SplitterJax:
    """JAX/Pallas port of the Splitter module's forward pass."""

    def __init__(self, dimensions, lambd, base_node_count, node_count, key):
        self.dimensions = dimensions
        self.lambd = lambd
        k1, k2, k3 = jax.random.split(key, 3)

        # torch.nn.Embedding default init: N(0, 1); padding_idx=0 row zeroed.
        def emb(k, count):
            w = jax.random.normal(k, (count, dimensions), dtype=jnp.float32)
            return w.at[0].set(0.0)

        self.base_node_embedding = emb(k1, base_node_count)
        self.node_embedding = emb(k2, node_count)
        self.node_noise_embedding = emb(k3, node_count)

    def forward(self, sources, contexts, targets, personas, pure_sources,
                tile_n=512):
        # Embedding lookups (gathers) are plain-JAX glue; slabs are presented
        # feature-major so the batch lands on the 128-lane axis in-kernel.
        node_f = jnp.take(self.node_embedding, sources, axis=0).T
        feature_f = jnp.take(self.node_noise_embedding, contexts, axis=0).T
        source_f = jnp.take(self.node_embedding, pure_sources, axis=0).T
        original_f = jnp.take(self.base_node_embedding, personas, axis=0).T
        targets_2d = targets.astype(jnp.float32).reshape(1, -1)
        return splitter_loss(node_f, feature_f, targets_2d,
                             source_f, original_f, lambd=self.lambd,
                             tile_n=tile_n)


def _reference_loss(model, sources, contexts, targets, personas, pure_sources):
    """Pure-JAX reference matching the PyTorch forward semantics."""
    node_f = jnp.take(model.node_embedding, sources, axis=0)
    node_f = node_f / jnp.maximum(
        jnp.linalg.norm(node_f, axis=1, keepdims=True), 1e-12)
    feat_f = jnp.take(model.node_noise_embedding, contexts, axis=0)
    feat_f = feat_f / jnp.maximum(
        jnp.linalg.norm(feat_f, axis=1, keepdims=True), 1e-12)
    scores = jax.nn.sigmoid(jnp.sum(node_f * feat_f, axis=1))
    t = targets.astype(jnp.float32)
    main = -jnp.mean(t * jnp.log(scores) + (1 - t) * jnp.log(1 - scores))
    src_f = jnp.take(model.node_embedding, pure_sources, axis=0)
    orig_f = jnp.take(model.base_node_embedding, personas, axis=0)
    rs = jax.nn.sigmoid(jnp.clip(jnp.sum(src_f * orig_f, axis=1), -15, 15))
    reg = -jnp.mean(jnp.log(rs))
    return main + model.lambd * reg


if __name__ == "__main__":
    key = jax.random.PRNGKey(0)
    (k_model, k_src, k_ctx, k_tgt, k_per, k_pure,
     k_src2, k_ctx2, k_tgt2, k_per2, k_pure2) = jax.random.split(key, 11)

    base_node_count = 10
    node_count = 16
    dimensions = 32
    batch = 8
    lambd = 0.1

    model = SplitterJax(dimensions, lambd, base_node_count, node_count, k_model)

    # --- small batch (single tile, padded to 128 lanes) ---------------------
    sources = jax.random.randint(k_src, (batch,), 0, node_count)
    contexts = jax.random.randint(k_ctx, (batch,), 0, node_count)
    targets = jax.random.randint(k_tgt, (batch,), 0, 2).astype(jnp.float32)
    personas = jax.random.randint(k_per, (batch,), 0, base_node_count)
    pure_sources = jax.random.randint(k_pure, (batch,), 0, node_count)

    loss = model.forward(sources, contexts, targets, personas, pure_sources)
    jax.block_until_ready(loss)
    ref = _reference_loss(model, sources, contexts, targets, personas,
                          pure_sources)
    assert jnp.allclose(loss, ref, atol=1e-5, rtol=1e-5), (loss, ref)

    # --- larger batch with a small tile: exercises multi-tile accumulation
    #     and last-tile masking ---------------------------------------------
    batch2 = 300
    sources2 = jax.random.randint(k_src2, (batch2,), 0, node_count)
    contexts2 = jax.random.randint(k_ctx2, (batch2,), 0, node_count)
    targets2 = jax.random.randint(k_tgt2, (batch2,), 0, 2).astype(jnp.float32)
    personas2 = jax.random.randint(k_per2, (batch2,), 0, base_node_count)
    pure_sources2 = jax.random.randint(k_pure2, (batch2,), 0, node_count)

    loss2 = model.forward(sources2, contexts2, targets2, personas2,
                          pure_sources2, tile_n=128)
    jax.block_until_ready(loss2)
    ref2 = _reference_loss(model, sources2, contexts2, targets2, personas2,
                           pure_sources2)
    assert jnp.allclose(loss2, ref2, atol=1e-5, rtol=1e-5), (loss2, ref2)

    print("KERNEL_OK")
</pallas_src>

<mosaic_0001>
module attributes {stable_mosaic.version = 11 : i64} {
  func.func @_splitter_loss_kernel(%arg0: i32, %arg1: memref<2xf32, #tpu.memory_space<smem>>, %arg2: memref<1xi32, #tpu.memory_space<smem>>, %arg3: memref<32x128xf32, #tpu.memory_space<vmem>>, %arg4: memref<32x128xf32, #tpu.memory_space<vmem>>, %arg5: memref<1x128xf32, #tpu.memory_space<vmem>>, %arg6: memref<32x128xf32, #tpu.memory_space<vmem>>, %arg7: memref<32x128xf32, #tpu.memory_space<vmem>>, %arg8: memref<1x1xf32, #tpu.memory_space<vmem>>, %arg9: memref<1x1xf32, #tpu.memory_space<vmem>>, %arg10: memref<1x1xf32, #tpu.memory_space<vmem>>) attributes {dimension_semantics = [#tpu.dimension_semantics<arbitrary>], iteration_bounds = array<i64: 1>, scalar_prefetch = 0 : i64, scratch_operands = 2 : i64, tpu.core_type = #tpu.core_type<tc>, window_params = [{transform_indices = @transform_0, window_bounds = array<i64: 2>}, {transform_indices = @transform_1, window_bounds = array<i64: 1>}, {transform_indices = @transform_2, window_bounds = array<i64: 32, 128>}, {transform_indices = @transform_3, window_bounds = array<i64: 32, 128>}, {transform_indices = @transform_4, window_bounds = array<i64: 1, 128>}, {transform_indices = @transform_5, window_bounds = array<i64: 32, 128>}, {transform_indices = @transform_6, window_bounds = array<i64: 32, 128>}, {pipeline_mode = #tpu.pipeline_mode<synchronous>, transform_indices = @transform_7, window_bounds = array<i64: 1, 1>}]} {
    %c0_i32 = arith.constant 0 : i32
    %0 = arith.cmpi eq, %arg0, %c0_i32 : i32
    %1 = arith.extui %0 : i1 to i32
    %c0_i32_0 = arith.constant 0 : i32
    %2 = arith.cmpi ne, %1, %c0_i32_0 : i32
    scf.if %2 {
      %cst_37 = arith.constant 0.000000e+00 : f32
      %76 = vector.broadcast %cst_37 : f32 to vector<1x1xf32>
      %c0_38 = arith.constant 0 : index
      %c0_39 = arith.constant 0 : index
      %77 = vector.load %arg9[%c0_38, %c0_39] : memref<1x1xf32, #tpu.memory_space<vmem>>, vector<1x1xf32>
      tpu.vector_store %arg9[%c0_38, %c0_39], %76 {strides = array<i32>} : memref<1x1xf32, #tpu.memory_space<vmem>>, vector<1x1xf32>,
      %cst_40 = arith.constant 0.000000e+00 : f32
      %78 = vector.broadcast %cst_40 : f32 to vector<1x1xf32>
      %c0_41 = arith.constant 0 : index
      %c0_42 = arith.constant 0 : index
      %79 = vector.load %arg10[%c0_41, %c0_42] : memref<1x1xf32, #tpu.memory_space<vmem>>, vector<1x1xf32>
      tpu.vector_store %arg10[%c0_41, %c0_42], %78 {strides = array<i32>} : memref<1x1xf32, #tpu.memory_space<vmem>>, vector<1x1xf32>,
    } else {
    }
    %c0 = arith.constant 0 : index
    %c0_1 = arith.constant 0 : index
    %3 = vector.load %arg3[%c0, %c0_1] : memref<32x128xf32, #tpu.memory_space<vmem>>, vector<32x128xf32>
    %c0_2 = arith.constant 0 : index
    %c0_3 = arith.constant 0 : index
    %4 = vector.load %arg4[%c0_2, %c0_3] : memref<32x128xf32, #tpu.memory_space<vmem>>, vector<32x128xf32>
    %5 = arith.mulf %3, %4 : vector<32x128xf32>
    %cst = arith.constant dense<0.000000e+00> : vector<128xf32>
    %6 = vector.multi_reduction <add>, %5, %cst [0] : vector<32x128xf32> to vector<128xf32>
    %7 = vector.shape_cast %6 : vector<128xf32> to vector<1x128xf32>
    %8 = arith.mulf %3, %3 : vector<32x128xf32>
    %cst_4 = arith.constant dense<0.000000e+00> : vector<128xf32>
    %9 = vector.multi_reduction <add>, %8, %cst_4 [0] : vector<32x128xf32> to vector<128xf32>
    %10 = vector.shape_cast %9 : vector<128xf32> to vector<1x128xf32>
    %11 = arith.mulf %4, %4 : vector<32x128xf32>
    %cst_5 = arith.constant dense<0.000000e+00> : vector<128xf32>
    %12 = vector.multi_reduction <add>, %11, %cst_5 [0] : vector<32x128xf32> to vector<128xf32>
    %13 = vector.shape_cast %12 : vector<128xf32> to vector<1x128xf32>
    %cst_6 = arith.constant 1.000000e-24 : f32
    %14 = vector.broadcast %cst_6 : f32 to vector<1x128xf32>
    %15 = arith.maximumf %10, %14 : vector<1x128xf32>
    %16 = math.rsqrt %15 : vector<1x128xf32>
    %17 = arith.mulf %7, %16 : vector<1x128xf32>
    %cst_7 = arith.constant 1.000000e-24 : f32
    %18 = vector.broadcast %cst_7 : f32 to vector<1x128xf32>
    %19 = arith.maximumf %13, %18 : vector<1x128xf32>
    %20 = math.rsqrt %19 : vector<1x128xf32>
    %21 = arith.mulf %17, %20 : vector<1x128xf32>
    %c0_8 = arith.constant 0 : index
    %c0_9 = arith.constant 0 : index
    %22 = vector.load %arg5[%c0_8, %c0_9] : memref<1x128xf32, #tpu.memory_space<vmem>>, vector<1x128xf32>
    %cst_10 = arith.constant 0.000000e+00 : f32
    %23 = vector.broadcast %cst_10 : f32 to vector<1x128xf32>
    %24 = arith.maximumf %21, %23 : vector<1x128xf32>
    %25 = math.absf %21 : vector<1x128xf32>
    %cst_11 = arith.constant 0.000000e+00 : f32
    %26 = vector.broadcast %cst_11 : f32 to vector<1x128xf32>
    %27 = arith.subf %26, %25 : vector<1x128xf32>
    %28 = math.exp %27 : vector<1x128xf32>
    %29 = math.log1p %28 : vector<1x128xf32>
    %30 = arith.addf %24, %29 : vector<1x128xf32>
    %31 = arith.mulf %22, %21 : vector<1x128xf32>
    %32 = arith.subf %30, %31 : vector<1x128xf32>
    %c0_12 = arith.constant 0 : index
    %c0_13 = arith.constant 0 : index
    %33 = vector.load %arg6[%c0_12, %c0_13] : memref<32x128xf32, #tpu.memory_space<vmem>>, vector<32x128xf32>
    %c0_14 = arith.constant 0 : index
    %c0_15 = arith.constant 0 : index
    %34 = vector.load %arg7[%c0_14, %c0_15] : memref<32x128xf32, #tpu.memory_space<vmem>>, vector<32x128xf32>
    %35 = arith.mulf %33, %34 : vector<32x128xf32>
    %cst_16 = arith.constant dense<0.000000e+00> : vector<128xf32>
    %36 = vector.multi_reduction <add>, %35, %cst_16 [0] : vector<32x128xf32> to vector<128xf32>
    %37 = vector.shape_cast %36 : vector<128xf32> to vector<1x128xf32>
    %cst_17 = arith.constant -1.500000e+01 : f32
    %cst_18 = arith.constant 1.500000e+01 : f32
    %38 = vector.broadcast %cst_17 : f32 to vector<1x128xf32>
    %39 = arith.maximumf %38, %37 : vector<1x128xf32>
    %40 = vector.broadcast %cst_18 : f32 to vector<1x128xf32>
    %41 = arith.minimumf %40, %39 : vector<1x128xf32>
    %cst_19 = arith.constant 0.000000e+00 : f32
    %42 = vector.broadcast %cst_19 : f32 to vector<1x128xf32>
    %43 = arith.subf %42, %41 : vector<1x128xf32>
    %cst_20 = arith.constant 0.000000e+00 : f32
    %44 = vector.broadcast %cst_20 : f32 to vector<1x128xf32>
    %45 = arith.maximumf %43, %44 : vector<1x128xf32>
    %46 = math.absf %43 : vector<1x128xf32>
    %cst_21 = arith.constant 0.000000e+00 : f32
    %47 = vector.broadcast %cst_21 : f32 to vector<1x128xf32>
    %48 = arith.subf %47, %46 : vector<1x128xf32>
    %49 = math.exp %48 : vector<1x128xf32>
    %50 = math.log1p %49 : vector<1x128xf32>
    %51 = arith.addf %45, %50 : vector<1x128xf32>
    %52 = tpu.iota {dimensions = array<i32: 1>} : vector<1x128xi32>
    %c128_i32 = arith.constant 128 : i32
    %53 = arith.muli %arg0, %c128_i32 : i32
    %54 = vector.broadcast %53 : i32 to vector<1x128xi32>
    %55 = arith.addi %52, %54 : vector<1x128xi32>
    %c0_22 = arith.constant 0 : index
    %56 = memref.load %arg2[%c0_22] : memref<1xi32, #tpu.memory_space<smem>>
    %57 = vector.broadcast %56 : i32 to vector<1x128xi32>
    %58 = arith.cmpi slt, %55, %57 : vector<1x128xi32>
    %c0_23 = arith.constant 0 : index
    %c0_24 = arith.constant 0 : index
    %59 = vector.load %arg9[%c0_23, %c0_24] : memref<1x1xf32, #tpu.memory_space<vmem>>, vector<1x1xf32>
    %cst_25 = arith.constant 0.000000e+00 : f32
    %60 = vector.broadcast %cst_25 : f32 to vector<1x128xf32>
    %61 = arith.select %58, %32, %60 : vector<1x128xi1>, vector<1x128xf32>
    %cst_26 = arith.constant dense<0.000000e+00> : vector<1xf32>
    %62 = vector.multi_reduction <add>, %61, %cst_26 [1] : vector<1x128xf32> to vector<1xf32>
    %63 = vector.shape_cast %62 : vector<1xf32> to vector<1x1xf32>
    %64 = arith.addf %59, %63 : vector<1x1xf32>
    %c0_27 = arith.constant 0 : index
    %c0_28 = arith.constant 0 : index
    %65 = vector.load %arg9[%c0_27, %c0_28] : memref<1x1xf32, #tpu.memory_space<vmem>>, vector<1x1xf32>
    tpu.vector_store %arg9[%c0_27, %c0_28], %64 {strides = array<i32>} : memref<1x1xf32, #tpu.memory_space<vmem>>, vector<1x1xf32>,
    %c0_29 = arith.constant 0 : index
    %c0_30 = arith.constant 0 : index
    %66 = vector.load %arg10[%c0_29, %c0_30] : memref<1x1xf32, #tpu.memory_space<vmem>>, vector<1x1xf32>
    %cst_31 = arith.constant 0.000000e+00 : f32
    %67 = vector.broadcast %cst_31 : f32 to vector<1x128xf32>
    %68 = arith.select %58, %51, %67 : vector<1x128xi1>, vector<1x128xf32>
    %cst_32 = arith.constant dense<0.000000e+00> : vector<1xf32>
    %69 = vector.multi_reduction <add>, %68, %cst_32 [1] : vector<1x128xf32> to vector<1xf32>
    %70 = vector.shape_cast %69 : vector<1xf32> to vector<1x1xf32>
    %71 = arith.addf %66, %70 : vector<1x1xf32>
    %c0_33 = arith.constant 0 : index
    %c0_34 = arith.constant 0 : index
    %72 = vector.load %arg10[%c0_33, %c0_34] : memref<1x1xf32, #tpu.memory_space<vmem>>, vector<1x1xf32>
    tpu.vector_store %arg10[%c0_33, %c0_34], %71 {strides = array<i32>} : memref<1x1xf32, #tpu.memory_space<vmem>>, vector<1x1xf32>,
    %c0_i32_35 = arith.constant 0 : i32
    %73 = arith.cmpi eq, %arg0, %c0_i32_35 : i32
    %74 = arith.extui %73 : i1 to i32
    %c0_i32_36 = arith.constant 0 : i32
    %75 = arith.cmpi ne, %74, %c0_i32_36 : i32
    scf.if %75 {
      %c0_37 = arith.constant 0 : index
      %76 = memref.load %arg1[%c0_37] : memref<2xf32, #tpu.memory_space<smem>>
      %c1 = arith.constant 1 : index
      %77 = memref.load %arg1[%c1] : memref<2xf32, #tpu.memory_space<smem>>
      %c0_38 = arith.constant 0 : index
      %c0_39 = arith.constant 0 : index
      %78 = vector.load %arg9[%c0_38, %c0_39] : memref<1x1xf32, #tpu.memory_space<vmem>>, vector<1x1xf32>
      %c0_40 = arith.constant 0 : index
      %c0_41 = arith.constant 0 : index
      %79 = vector.load %arg10[%c0_40, %c0_41] : memref<1x1xf32, #tpu.memory_space<vmem>>, vector<1x1xf32>
      %80 = vector.broadcast %76 : f32 to vector<1x1xf32>
      %81 = arith.mulf %80, %79 : vector<1x1xf32>
      %82 = arith.addf %78, %81 : vector<1x1xf32>
      %83 = vector.broadcast %77 : f32 to vector<1x1xf32>
      %84 = arith.mulf %83, %82 : vector<1x1xf32>
      %c0_42 = arith.constant 0 : index
      %c0_43 = arith.constant 0 : index
      %85 = vector.load %arg8[%c0_42, %c0_43] : memref<1x1xf32, #tpu.memory_space<vmem>>, vector<1x1xf32>
      tpu.vector_store %arg8[%c0_42, %c0_43], %84 {strides = array<i32>} : memref<1x1xf32, #tpu.memory_space<vmem>>, vector<1x1xf32>,
    } else {
    }
    return
  }
  func.func @transform_0(%arg0: i32) -> i32 {
    %c0_i32 = arith.constant 0 : i32
    %c0_i32_0 = arith.constant 0 : i32
    return %c0_i32 : i32
  }
  func.func @transform_1(%arg0: i32) -> i32 {
    %c0_i32 = arith.constant 0 : i32
    %c0_i32_0 = arith.constant 0 : i32
    return %c0_i32 : i32
  }
  func.func @transform_2(%arg0: i32) -> (i32, i32) {
    %c0_i32 = arith.constant 0 : i32
    %c0_i32_0 = arith.constant 0 : i32
    return %c0_i32, %arg0 : i32, i32
  }
  func.func @transform_3(%arg0: i32) -> (i32, i32) {
    %c0_i32 = arith.constant 0 : i32
    %c0_i32_0 = arith.constant 0 : i32
    return %c0_i32, %arg0 : i32, i32
  }
  func.func @transform_4(%arg0: i32) -> (i32, i32) {
    %c0_i32 = arith.constant 0 : i32
    %c0_i32_0 = arith.constant 0 : i32
    return %c0_i32, %arg0 : i32, i32
  }
  func.func @transform_5(%arg0: i32) -> (i32, i32) {
    %c0_i32 = arith.constant 0 : i32
    %c0_i32_0 = arith.constant 0 : i32
    return %c0_i32, %arg0 : i32, i32
  }
  func.func @transform_6(%arg0: i32) -> (i32, i32) {
    %c0_i32 = arith.constant 0 : i32
    %c0_i32_0 = arith.constant 0 : i32
    return %c0_i32, %arg0 : i32, i32
  }
  func.func @transform_7(%arg0: i32) -> (i32, i32) {
    %c0_i32 = arith.constant 0 : i32
    %c0_i32_0 = arith.constant 0 : i32
    %c0_i32_1 = arith.constant 0 : i32
    return %c0_i32, %c0_i32_0 : i32, i32
  }
}

</mosaic_0001>

<bundles_post_ra>
// kernel: tpu_custom_call.1
= control target key start
LH: loop header
LB: loop body
LE: loop exit
PB: predicated region body
PF: predicated region fallthrough
CT: control target
= control target key end

     0   :  { %13 = vsyncpa [#allocation8], 0  ;;  %s572_s0 = inlined_call_operand.vmem [shape: f32[2], index: 0, kind: input, shape index: {}]   ;;  %s573_s1 = inlined_call_operand.<no memory space> [shape: s32[1], index: 1, kind: input, shape index: {}]   ;;  %s574_s2 = inlined_call_operand.hbm [shape: f32[32,128], index: 2, kind: input, shape index: {}]   ;;  %s575_s3 = inlined_call_operand.hbm [shape: f32[32,128], index: 3, kind: input, shape index: {}]   ;;  %s576_s4 = inlined_call_operand.vmem [shape: f32[1,128], index: 4, kind: input, shape index: {}]   ;;  %s577_s5 = inlined_call_operand.hbm [shape: f32[32,128], index: 5, kind: input, shape index: {}]   ;;  %s578_s6 = inlined_call_operand.hbm [shape: f32[32,128], index: 6, kind: input, shape index: {}]   ;;  %s579_s7 = inlined_call_operand.hbm [shape: f32[1,1], index: 7, kind: output, shape index: {}]  }
   0x1   :  { %14 = vsyncpa [#allocation6], 0 }
   0x2   :  { %15 = vsyncpa [#allocation11], 0 }
   0x3   :  { %16 = vsyncpa [#allocation14], 0 }
   0x4   :  { %17 = vsyncpa [#allocation7], 0  ;;  %s24_s26 = sshll.u32 %s572_s0, 4  ;;  %s422_s27 = smov [#allocation10]   ;;  %s25_s26 = int_to_ptr.vmem [resolvable:$true] %s24_s26 }
   0x5   :  { %s47_s28 = sshll.u32 %s422_s27, 4  ;;  %s290_s8 = scalar_lea.hbm %s575_s3, 512  ;;  %s48_s28 = int_to_ptr.vmem [resolvable:$true] %s47_s28 }
   0x6   :  { %p291_p0 = scmp.ne.s32.totalorder %s575_s3, %s290_s8  ;;  %p294_p1 = scmp.lt.u32.totalorder %s290_s8, %s575_s3 }
   0x8   :  { %p296_p2 = pnand %p294_p1, %p291_p0 }
   0xa   :  { %299 = shalt.err (!%p296_p2)
}
   0xb   :  { %s300_s13 = scalar_lea.vmem %s48_s28, 512  ;;  %p305_p4 = scmp.lt.s32.totalorder %s48_s28, %s48_s28 }
   0xc   :  { %p301_p3 = scmp.ne.s32.totalorder %s48_s28, %s300_s13  ;;  %p306_p5 = scmp.lt.s32.totalorder %s300_s13, %s300_s13 }
   0xe   :  { %p307_p6 = por %p306_p5, %p305_p4 }
  0x10   :  { %p308_p7 = pnand %p307_p6, %p301_p3 }
  0x12   :  { %311 = shalt.err (!%p308_p7)
}
  0x13   :  { %s423_s0 = smov 128   ;;  %s424_s14 = smov 8  }
  0x14   :  { %53 = dma.hbm_to_vmem [thread:$0]  %s575_s3, 512, %s48_s28, [#allocation11], %s423_s0, %s423_s0, %s424_s14  }
  0x15   :  { %s312_s17 = scalar_lea.vmem %s25_s26, 16  ;;  %p317_p9 = scmp.lt.s32.totalorder %s25_s26, %s25_s26 }
  0x16   :  { %p313_p8 = scmp.ne.s32.totalorder %s25_s26, %s312_s17  ;;  %p318_p10 = scmp.lt.s32.totalorder %s312_s17, %s312_s17 }
  0x18   :  { %p319_p11 = por %p318_p10, %p317_p9 }
  0x1a   :  { %p320_p12 = pnand %p319_p11, %p313_p8 }
  0x1c   :  { %323 = shalt.err (!%p320_p12)
}
  0x1d   :  { %s425_s18 = smov [#allocation5]   ;;  %s426_s19 = smov [#allocation9]  }
  0x1e   :  { %27 = dma.vmem_to_smem %s25_s26, 16, %s425_s18, [#allocation8]  }
  0x1f   :  { %s35_s20 = sshll.u32 %s426_s19, 4  ;;  %s427_s21 = smov [#allocation12]   ;;  %s36_s20 = int_to_ptr.vmem [resolvable:$true] %s35_s20 }
  0x20   :  { %s61_s22 = sshll.u32 %s427_s21, 4  ;;  %s324_s3 = scalar_lea.hbm %s574_s2, 512  ;;  %s489_s22 = int_to_ptr.vmem [resolvable:$true] %s61_s22 }
  0x21   :  { %p325_p13 = scmp.ne.s32.totalorder %s574_s2, %s324_s3  ;;  %p328_p0 = scmp.lt.u32.totalorder %s324_s3, %s574_s2 }
  0x23   :  { %p330_p1 = pnand %p328_p0, %p325_p13 }
  0x25   :  { %333 = shalt.err (!%p330_p1)
}
  0x26   :  { %s334_s26 = scalar_lea.vmem %s36_s20, 512  ;;  %p339_p3 = scmp.lt.s32.totalorder %s36_s20, %s36_s20 }
  0x27   :  { %p335_p2 = scmp.ne.s32.totalorder %s36_s20, %s334_s26  ;;  %p340_p4 = scmp.lt.s32.totalorder %s334_s26, %s334_s26 }
  0x29   :  { %p341_p5 = por %p340_p4, %p339_p3 }
  0x2b   :  { %p342_p6 = pnand %p341_p5, %p335_p2 }
  0x2d   :  { %345 = shalt.err (!%p342_p6)
}
  0x2e   :  { %41 = dma.hbm_to_vmem [thread:$0]  %s574_s2, 512, %s36_s20, [#allocation6], %s423_s0, %s423_s0, %s424_s14  }
  0x2f   :  { %s346_s11 = scalar_lea.hbm %s577_s5, 512 }
  0x30   :  { %p347_p7 = scmp.ne.s32.totalorder %s577_s5, %s346_s11  ;;  %p350_p8 = scmp.lt.u32.totalorder %s346_s11, %s577_s5 }
  0x32   :  { %p352_p9 = pnand %p350_p8, %p347_p7 }
  0x34   :  { %355 = shalt.err (!%p352_p9)
}
  0x35   :  { %s356_s17 = scalar_lea.vmem %s489_s22, 512  ;;  %p361_p11 = scmp.lt.s32.totalorder %s489_s22, %s489_s22 }
  0x36   :  { %p357_p10 = scmp.ne.s32.totalorder %s489_s22, %s356_s17  ;;  %p362_p12 = scmp.lt.s32.totalorder %s356_s17, %s356_s17 }
  0x38   :  { %p363_p13 = por %p362_p12, %p361_p11 }
  0x3a   :  { %p364_p0 = pnand %p363_p13, %p357_p10 }
  0x3c   :  { %367 = shalt.err (!%p364_p0)
}
  0x3d   :  { %67 = dma.hbm_to_vmem [thread:$0]  %s577_s5, 512, %s489_s22, [#allocation11], %s423_s0, %s423_s0, %s424_s14  }
  0x3e   :  { %s428_s19 = smov [#allocation13]   ;;  %s368_s24 = scalar_lea.hbm %s578_s6, 512 }
  0x3f   :  { %s73_s20 = sshll.u32 %s428_s19, 4  ;;  %p369_p1 = scmp.ne.s32.totalorder %s578_s6, %s368_s24  ;;  %s74_s20 = int_to_ptr.vmem [resolvable:$true] %s73_s20 }
  0x40   :  { %p372_p2 = scmp.lt.u32.totalorder %s368_s24, %s578_s6 }
  0x42   :  { %p374_p3 = pnand %p372_p2, %p369_p1 }
  0x44   :  { %377 = shalt.err (!%p374_p3)
}
  0x45   :  { %s378_s29 = scalar_lea.vmem %s74_s20, 512  ;;  %p383_p5 = scmp.lt.s32.totalorder %s74_s20, %s74_s20 }
  0x46   :  { %p379_p4 = scmp.ne.s32.totalorder %s74_s20, %s378_s29  ;;  %p384_p6 = scmp.lt.s32.totalorder %s378_s29, %s378_s29 }
  0x48   :  { %p385_p7 = por %p384_p6, %p383_p5 }
  0x4a   :  { %p386_p8 = pnand %p385_p7, %p379_p4 }
  0x4c   :  { %389 = shalt.err (!%p386_p8)
}
  0x4d   :  { %79 = dma.hbm_to_vmem [thread:$0]  %s578_s6, 512, %s74_s20, [#allocation14], %s423_s0, %s423_s0, %s424_s14  }
  0x4e   :  { %412 = dma.done.wait [#allocation8], 16  }
  0x4f   :  { %413 = vsyncadd [#allocation8], 4294967280 }
  0x50   :  { %414 = dma.done.wait [#allocation6], 512  }
  0x51   :  { %415 = vsyncadd [#allocation6], 4294966784 }
  0x52   :  { %416 = dma.done.wait [#allocation11], 1024  }
  0x53   :  { %417 = vsyncadd [#allocation11], 4294966272 }
  0x54   :  { %418 = dma.done.wait [#allocation14], 512  }
  0x55   :  { %419 = vsyncadd [#allocation14], 4294966784 }
  0x56   :  { %95 = sfence }
  0x57   :  { %v174_v0 = vld [vmem:[#allocation12] sm:$0xff]  ;;  %v175_v1 = vld [vmem:[#allocation12 + $0x8] sm:$0xff]  ;;  %v176_v2 = vld [vmem:[#allocation12 + $0x10] sm:$0xff]  ;;  %vm100_vm3 = vcmask 0   ;;  %vm223_vm4 = vcmask 1040384   ;;  %s430_s30 = smov [#allocation15]  }
  0x58   :  { %v177_v3 = vld [vmem:[#allocation12 + $0x18] sm:$0xff]  ;;  %v178_v4 = vld [vmem:[#allocation13] sm:$0xff]  ;;  %v179_v5 = vld [vmem:[#allocation13 + $0x8] sm:$0xff]  ;;  %s255_s8 = sshll.u32 %s430_s30, 4  ;;  %s256_s8 = int_to_ptr.vmem [resolvable:$true] %s255_s8 }
  0x59   :  { %v180_v6 = vld [vmem:[#allocation13 + $0x10] sm:$0xff]  ;;  %v181_v7 = vld [vmem:[#allocation13 + $0x18] sm:$0xff]  ;;  %v182_v8 = vmul.f32 %v178_v4, %v174_v0  ;;  %v183_v9 = vmul.f32 %v179_v5, %v175_v1  ;;  %v103_v10 = vld [vmem:[#allocation9] sm:$0xff]  ;;  %s390_s9 = scalar_lea.vmem %s256_s8, 16  ;;  %s394_s10 = scalar_lea.vmem %s256_s8, 32 }
  0x5a   :  { %v184_v11 = vmul.f32 %v180_v6, %v176_v2  ;;  %v104_v12 = vld [vmem:[#allocation9 + $0x8] sm:$0xff]  ;;  %v105_v13 = vld [vmem:[#allocation9 + $0x10] sm:$0xff]  ;;  %v106_v14 = vld [vmem:[#allocation9 + $0x18] sm:$0xff]  ;;  %v124_v15 = vmul.f32 %v103_v10, %v103_v10  ;;  %v185_v16 = vmul.f32 %v181_v7, %v177_v3  ;;  %p391_p9 = scmp.ne.s32.totalorder %s256_s8, %s390_s9  ;;  %p395_p10 = scmp.lt.s32.totalorder %s256_s8, %s256_s8 }
  0x5b   :  { %v186_v17 = vadd.f32 %v183_v9, %v182_v8  ;;  %v107_v18 = vld [vmem:[#allocation10] sm:$0xff]  ;;  %v108_v19 = vld [vmem:[#allocation10 + $0x8] sm:$0xff]  ;;  %v109_v20 = vld [vmem:[#allocation10 + $0x10] sm:$0xff]  ;;  %v125_v21 = vmul.f32 %v104_v12, %v104_v12  ;;  %v126_v22 = vmul.f32 %v105_v13, %v105_v13  ;;  %v127_v28 = vmul.f32 %v106_v14, %v106_v14  ;;  %p396_p11 = scmp.lt.s32.totalorder %s394_s10, %s390_s9 }
  0x5c   :  { %v111_v23 = vmul.f32 %v107_v18, %v103_v10  ;;  %v112_v24 = vmul.f32 %v108_v19, %v104_v12  ;;  %v113_v25 = vmul.f32 %v109_v20, %v105_v13  ;;  %v110_v27 = vld [vmem:[#allocation10 + $0x18] sm:$0xff]  ;;  %v137_v30 = vmul.f32 %v107_v18, %v107_v18 }
  0x5d   :  { %v187_v26 = vadd.f32 %v186_v17, %v184_v11  ;;  %v128_v29 = vadd.f32 %v125_v21, %v124_v15  ;;  %v114_v31 = vmul.f32 %v110_v27, %v106_v14  ;;  %v138_v33 = vmul.f32 %v108_v19, %v108_v19  ;;  %p397_p12 = por %p396_p11, %p395_p10 }
  0x5e   :  { %v115_v32 = vadd.f32 %v112_v24, %v111_v23  ;;  %v139_v34 = vmul.f32 %v109_v20, %v109_v20  ;;  %v140_v38 = vmul.f32 %v110_v27, %v110_v27 }
  0x5f   :  { %v188_v35 = vadd.f32 %v187_v26, %v185_v16  ;;  %v129_v36 = vadd.f32 %v128_v29, %v126_v22  ;;  %v141_v39 = vadd.f32 %v138_v33, %v137_v30  ;;  %v213_v22 = vlaneseq  ;;  %p398_p13 = pnand %p397_p12, %p391_p9 }
  0x60   :  { %v116_v37 = vadd.f32 %v115_v32, %v113_v25 }
  0x61   :  { %v189_v40 = vrot.slane %v188_v35, 4  ;;  %v130_v41 = vadd.f32 %v129_v36, %v127_v28  ;;  %v142_v43 = vadd.f32 %v141_v39, %v139_v34  ;;  %v214_v25 = vand.u32 127, %v213_v22  ;;  %v156_v39 = vld [vmem:[%s576_s4] sm:$0x1]  ;;  %s268_s4 = sld [smem:[#allocation5 + $0x1]] }
  0x62   :  { %v117_v42 = vadd.f32 %v116_v37, %v114_v31  ;;  %v219_v28 = vstv %s573_s1  ;;  %s239_s1 = sld [smem:[#allocation5]] }
  0x63   :  { %v190_v44 = vadd.f32 %v189_v40, %v188_v35  ;;  %v131_v45 = vrot.slane %v130_v41, 4  ;;  %v143_v47 = vadd.f32 %v142_v43, %v140_v38  ;;  %vm544_vm1 = vcmp.lt.s32.totalorder %v214_v25, %v219_v28 }
  0x64   :  { %v118_v46 = vrot.slane %v117_v42, 4 }
  0x65   :  { %v191_v48 = vrot.slane %v190_v44, 2  ;;  %v132_v49 = vadd.f32 %v131_v45, %v130_v41  ;;  %v144_v50 = vrot.slane %v143_v47, 4 }
  0x66   :  { %v119_v53 = vadd.f32 %v118_v46, %v117_v42 }
  0x67   :  { %v192_v51 = vadd.f32 %v191_v48, %v190_v44  ;;  %v133_v52 = vrot.slane %v132_v49, 2  ;;  %v145_v54 = vadd.f32 %v144_v50, %v143_v47  ;;  %v429_v47 = vmov 0.0  }
  0x68   :  { %v120_v60 = vrot.slane %v119_v53, 2  ;;  %102 = vst.msk [vmem:[#allocation3] sm:$0x1] %vm100_vm3, %v429_v47  ;;  %101 = vst.msk [vmem:[#allocation2] sm:$0x1] %vm100_vm3, %v429_v47 }
  0x69   :  { %v193_v55 = vrot.slane %v192_v51, 1  ;;  %v134_v56 = vadd.f32 %v133_v52, %v132_v49  ;;  %v146_v57 = vrot.slane %v145_v54, 2 }
  0x6a   :  { %v121_v3 = vadd.f32 %v120_v60, %v119_v53 }
  0x6b   :  { %v194_v58 = vadd.f32 %v193_v55, %v192_v51  ;;  %v135_v59 = vrot.slane %v134_v56, 1  ;;  %v147_v61 = vadd.f32 %v146_v57, %v145_v54 }
  0x6c   :  { %v122_v8 = vrot.slane %v121_v3, 1 }
  0x6d   :  { %v267_v62 = vclamps-f32 %v194_v58, 15.0  ;;  %v136_v63 = vadd.f32 %v135_v59, %v134_v56  ;;  %v148_v0 = vrot.slane %v147_v61, 1  ;;  %v243_v58 = vstv %s239_s1 }
  0x6e   :  { %v123_v10 = vadd.f32 %v122_v8, %v121_v3 }
  0x6f   :  { %v197_v1 = vsub.f32 0.0, %v267_v62  ;;  %v150_v2 = vmax.f32 %v136_v63, 1e-24  ;;  %v149_v4 = vadd.f32 %v148_v0, %v147_v61  ;;  %v230_v51 = vld [vmem:[#allocation3] sm:$0x1]  ;;  %v246_v61 = vstv %s268_s4 }
  0x70   :  { %v221_v54 = vld [vmem:[#allocation2] sm:$0x1] }
  0x71   :  { %v199_v5 = vand.u32 2147483647, %v197_v1  ;;  %278 = vrsqrt.f32 %v150_v2  ;;  %v153_v6 = vmax.f32 %v149_v4, 1e-24  ;;  %v198_v27 = vmax.f32 %v197_v1, 0.0 }
  0x73   :  { %v200_v7 = vsub.f32 0.0, %v199_v5  ;;  %280 = vrsqrt.f32 %v153_v6 }
  0x75   :  { %v201_v9 = vmul.f32 1.442695, %v200_v7 }
  0x77   :  { %282 = vpow2.f32 %v201_v9 }
  0x7b   :  { %v279_v11 = vpop.eup %278 }
  0x7c   :  { %v152_v12 = vmul.f32 %v279_v11, %v123_v10 }
  0x7d   :  { %v281_v13 = vpop.eup %280 }
  0x7e   :  { %v155_v14 = vmul.f32 %v281_v13, %v152_v12 }
  0x80   :  { %v158_v16 = vand.u32 2147483647, %v155_v14  ;;  %v157_v42 = vmax.f32 %v155_v14, 0.0  ;;  %v172_v44 = vmul.f32 %v156_v39, %v155_v14 }
  0x81   :  { %v283_v15 = vpop.eup %282 }
  0x82   :  { %v203_v17 = vadd.f32 1.0, %v283_v15  ;;  %v159_v18 = vsub.f32 0.0, %v158_v16  ;;  %v206_v19 = vmul.f32 -0.5, %v283_v15  ;;  %v209_v23 = vand.u32 2147483647, %v283_v15 }
  0x84   :  { %284 = vlog2.f32 %v203_v17  ;;  %v160_v20 = vmul.f32 1.442695, %v159_v18  ;;  %v207_v21 = vadd.f32 1.0, %v206_v19  ;;  %vm210_vm0 = vcmp.lt.f32.partialorder %v209_v23, 0.0004427343 }
  0x86   :  { %286 = vpow2.f32 %v160_v20  ;;  %v208_v24 = vmul.f32 %v283_v15, %v207_v21 }
  0x8e   :  { %v285_v26 = vpop.eup %284 }
  0x8f   :  { %v205_v29 = vmul.f32 0.6931472, %v285_v26 }
  0x90   :  { %v287_v30 = vpop.eup %286 }
  0x91   :  { %v211_v31 = vsel %vm210_vm0, %v208_v24, %v205_v29  ;;  %v162_v34 = vadd.f32 1.0, %v287_v30  ;;  %v165_v36 = vmul.f32 -0.5, %v287_v30  ;;  %v168_v38 = vand.u32 2147483647, %v287_v30 }
  0x92   :  { %v212_v33 = vadd.f32 %v211_v31, %v198_v27 }
  0x93   :  { %288 = vlog2.f32 %v162_v34  ;;  %v166_v37 = vadd.f32 1.0, %v165_v36  ;;  %vm169_vm2 = vcmp.lt.f32.partialorder %v168_v38, 0.0004427343 }
  0x94   :  { %v231_v35 = vsel %vm544_vm1, %v212_v33, 0.0 }
  0x95   :  { %232 = vadd.xlane.f32.xlu0 %v231_v35  ;;  %v167_v40 = vmul.f32 %v287_v30, %v166_v37 }
  0x9d   :  { %v289_v41 = vpop.eup %288 }
  0x9e   :  { %v164_v43 = vmul.f32 0.6931472, %v289_v41 }
  0xa0   :  { %v170_v45 = vsel %vm169_vm2, %v167_v40, %v164_v43 }
  0xa1   :  { %v171_v46 = vadd.f32 %v170_v45, %v157_v42 }
  0xa3   :  { %v173_v48 = vsub.f32 %v171_v46, %v172_v44 }
  0xa5   :  { %v222_v49 = vsel %vm544_vm1, %v173_v48, 0.0 }
  0xa6   :  { %v224_v50 = vsel %vm223_vm4, %v222_v49, 0.0 }
  0xa7   :  { %225 = vadd.xlane.f32.xlu0 %v224_v50 }
 0x122   :  { %v233_v52 = vpop.xlane.xlu0 %232 }
 0x123   :  { %v234_v53 = vadd.f32 %v233_v52, %v230_v51 }
 0x125   :  { %235 = vst.msk [vmem:[#allocation3] sm:$0x1] %vm100_vm3, %v234_v53 }
 0x12c   :  { %v242_v57 = vld [vmem:[#allocation3] sm:$0x1] }
 0x12d   :  { %v244_v59 = vmul.f32 %v243_v58, %v242_v57 }
 0x134   :  { %v226_v55 = vpop.xlane.xlu0 %225 }
 0x135   :  { %v227_v56 = vadd.f32 %v226_v55, %v221_v54 }
 0x137   :  { %229 = vst.msk [vmem:[#allocation2] sm:$0x1] %vm100_vm3, %v227_v56 }
 0x13e   :  { %v241_v60 = vld [vmem:[#allocation2] sm:$0x1] }
 0x13f   :  { %v245_v62 = vadd.f32 %v244_v59, %v241_v60 }
 0x141   :  { %v247_v63 = vmul.f32 %v246_v61, %v245_v62 }
 0x143   :  { %248 = vst.msk [vmem:[#allocation15] sm:$0x1] %vm100_vm3, %v247_v63 }
 0x144   :  { %401 = shalt.err (!%p398_p13)
}
 0x145   :  { %s402_s13 = scalar_lea.hbm %s579_s7, 16 }
 0x146   :  { %p403_p0 = scmp.ne.s32.totalorder %s579_s7, %s402_s13  ;;  %p406_p1 = scmp.lt.u32.totalorder %s402_s13, %s579_s7 }
 0x148   :  { %p408_p2 = pnand %p406_p1, %p403_p0 }
 0x14a   :  { %411 = shalt.err (!%p408_p2)
}
 0x14b   :  { %258 = dma.vmem_to_hbm [thread:$0]  %s256_s8, 16, %s579_s7, [#allocation7]  }
 0x14c   :  { %420 = dma.done.wait [#allocation7], 16  }
 0x14d   :  { %421 = vsyncadd [#allocation7], 4294967280 }
 0x14e   :  { %262 = vsyncpa [#allocation6], 1 }
 0x14f   :  { %263 = vsyncpa [#allocation11], 1 }
 0x150   :  { %264 = vsyncpa [#allocation14], 1 }
 0x151   :  { %265 = vsyncpa [#allocation7], 1 }
 0x152   :  { %266 = vsyncpa [#allocation8], 1 }

</bundles_post_ra>
